<compile_context>
chip_gen: v7x
topology: tpu7x:2x2x1
jax: 0.10.0
libtpu: 0.0.40
codegen_flags: <defaults>
</compile_context>

<pallas_src>
import functools

import jax
import jax.numpy as jnp
from jax.experimental import pallas as pl
from jax.experimental.pallas import tpu as pltpu

# Above every generation's default scoped limit (16/32 MiB), below v7x's 64 MiB physical.
_VMEM_LIMIT = 48 * 1024 * 1024


# ----------------------- kernel 1: class embeddings ------------------------------------

def _emb_kernel(raw_ref, w_ref, b_ref, emb_ref):
    # emb = F.normalize(Embedding(emb_raw[:K]), p=2, dim=1); bf16 out for downstream MXU.
    proj = (jnp.dot(raw_ref[...], w_ref[...], preferred_element_type=jnp.float32)
            + b_ref[...])                                            # (tk, F) f32
    ss = jnp.sum(proj * proj, axis=1, keepdims=True)
    emb_ref[...] = (proj * jax.lax.rsqrt(jnp.maximum(ss, 1e-24))).astype(emb_ref.dtype)


# ----------------------- kernel 2: batch path + cross entropy --------------------------

def _ce_kernel(x_ref, w_ref, b_ref, emb_ref, y_ref, ce_ref, *, inv_temperature):
    # GAP already folded into w_ref: feat = x2d @ (w_cnn/HW repeated over spatial).
    feat = (jnp.dot(x_ref[...], w_ref[...], preferred_element_type=jnp.float32)
            + b_ref[...])                                            # (tb, F) f32
    ss = jnp.sum(feat * feat, axis=1, keepdims=True)
    x = feat * (jax.lax.rsqrt(jnp.maximum(ss, 1e-24)) * inv_temperature)
    # p = x @ emb.T — contract the feature axis of both operands (no relayout).
    p = jax.lax.dot_general(x.astype(jnp.bfloat16), emb_ref[...],
                            (((1,), (1,)), ((), ())),
                            preferred_element_type=jnp.float32)      # (tb, K) f32
    m = jnp.max(p, axis=1, keepdims=True)
    lse = jnp.log(jnp.sum(jnp.exp(p - m), axis=1, keepdims=True)) + m
    cols = jax.lax.broadcasted_iota(jnp.int32, p.shape, 1)
    onehot = (cols == y_ref[...]).astype(jnp.float32)                # y_ref: (tb, 1)
    picked = jnp.sum(p * onehot, axis=1, keepdims=True)
    ce_ref[...] = lse - picked                                       # per-row CE term


# ----------------------- kernel 3: structural loss accumulators ------------------------

def _struc_kernel(emb_slab_ref, emb_full_ref, struc_ref, out_ref, acc_ref):
    i = pl.program_id(0)

    @pl.when(i == 0)
    def _():
        acc_ref[0] = 0.0
        acc_ref[1] = 0.0
        acc_ref[2] = 0.0

    gram = jax.lax.dot_general(emb_slab_ref[...], emb_full_ref[...],
                               (((1,), (1,)), ((), ())),
                               preferred_element_type=jnp.float32)   # (tk, K)
    # Rows of emb are l2-normalised -> ||e_i - e_j||^2 == 2 - 2<e_i, e_j>.
    struc_e = jnp.sqrt(jnp.maximum(2.0 - 2.0 * gram, 0.0))
    a = struc_ref[...]                                               # pre-normalised struc slab
    acc_ref[0] += jnp.sum(a * struc_e)                               # sum(a' * b)
    acc_ref[1] += jnp.sum(struc_e)                                   # sum(b)
    acc_ref[2] += jnp.sum(struc_e * struc_e)                         # sum(b^2)

    @pl.when(i == pl.num_programs(0) - 1)
    def _():
        out_ref[0] = acc_ref[0]
        out_ref[1] = acc_ref[1]
        out_ref[2] = acc_ref[2]


# --------------------------------- wrapper ----------------------------------------------

def _divisor_tile(dim, pref):
    """Largest tile <= pref that divides dim (falls back towards smaller powers of two)."""
    t = max(1, min(pref, dim))
    while dim % t != 0:
        t //= 2
    return max(t, 1)


def cdzs_forward_train(x_img, y, params, *, temperature, struc_weight,
                       batch_tile=256, class_tile=512):
    """Returns (loss, source_loss, struc_loss) — CDZS.forward(..., is_train='True').

    batch_tile / class_tile default to 256/512 (MXU-friendly on v6e/v7x; use 128 on v5e).
    """
    N, C, H, W = x_img.shape
    HW = H * W
    K = params["struc"].shape[0]
    Dw = params["emb_raw"].shape[1]
    F = params["w_cnn"].shape[1]

    tb = _divisor_tile(N, batch_tile)
    tk = _divisor_tile(K, class_tile)

    # ---- constant / parameter prep (cached at module-init time in the real model) ----
    # Fold the global-average-pool into the CNN-stub weights (feat = x2d @ w_gap + b).
    w_gap = (jnp.repeat(params["w_cnn"], HW, axis=0) * (1.0 / HW)).astype(jnp.bfloat16)
    x2d = x_img.reshape(N, C * HW).astype(jnp.bfloat16)
    y2d = y.reshape(N, 1).astype(jnp.int32)
    emb_raw = params["emb_raw"][:K].astype(jnp.bfloat16)   # row-wise linear -> slice first
    w_emb = params["w_emb"].astype(jnp.bfloat16)
    b_emb = params["b_emb"].astype(jnp.float32)
    b_cnn = params["b_cnn"].astype(jnp.float32)
    # self.struc is a constant buffer -> pre-normalise by its mean once (l2_loss's a/mean(a)).
    struc_n = (params["struc"] / jnp.mean(params["struc"])).astype(jnp.float32)
    s_aa = jnp.sum(struc_n * struc_n)                       # constant sum(a'^2)

    cp_par = pltpu.CompilerParams(dimension_semantics=("parallel",),
                                  vmem_limit_bytes=_VMEM_LIMIT)
    cp_arb = pltpu.CompilerParams(dimension_semantics=("arbitrary",),
                                  vmem_limit_bytes=_VMEM_LIMIT)

    # ---- kernel 1: emb = l2norm(Embedding(emb_raw[:K])) -> (K, F) bf16 ----
    emb = pl.pallas_call(
        _emb_kernel,
        out_shape=jax.ShapeDtypeStruct((K, F), jnp.bfloat16),
        grid=(K // tk,),
        in_specs=[pl.BlockSpec((tk, Dw), lambda i: (i, 0)),
                  pl.BlockSpec((Dw, F), lambda i: (0, 0)),
                  pl.BlockSpec((1, F), lambda i: (0, 0))],
        out_specs=pl.BlockSpec((tk, F), lambda i: (i, 0)),
        compiler_params=cp_par,
        cost_estimate=pl.CostEstimate(
            flops=2 * K * Dw * F, transcendentals=K,
            bytes_accessed=K * Dw * 2 + Dw * F * 2 + F * 4 + K * F * 2),
    )(emb_raw, w_emb, b_emb)

    # ---- kernel 2: batch tiles -> per-row cross-entropy contributions (N, 1) ----
    ce_rows = pl.pallas_call(
        functools.partial(_ce_kernel, inv_temperature=1.0 / temperature),
        out_shape=jax.ShapeDtypeStruct((N, 1), jnp.float32),
        grid=(N // tb,),
        in_specs=[pl.BlockSpec((tb, C * HW), lambda i: (i, 0)),
                  pl.BlockSpec((C * HW, F), lambda i: (0, 0)),
                  pl.BlockSpec((1, F), lambda i: (0, 0)),
                  pl.BlockSpec((K, F), lambda i: (0, 0)),     # emb stays resident
                  pl.BlockSpec((tb, 1), lambda i: (i, 0))],
        out_specs=pl.BlockSpec((tb, 1), lambda i: (i, 0)),
        compiler_params=cp_par,
        cost_estimate=pl.CostEstimate(
            flops=2 * N * C * HW * F + 2 * N * F * K,
            transcendentals=N * K + 2 * N,
            bytes_accessed=N * C * HW * 2 + C * HW * F * 2 + K * F * 2 + N * 8),
    )(x2d, w_gap, b_cnn, emb, y2d)

    # ---- kernel 3: K-row slabs of the KxK cdist, scalar accumulators ----
    struc_acc = pl.pallas_call(
        _struc_kernel,
        out_shape=jax.ShapeDtypeStruct((3,), jnp.float32),
        grid=(K // tk,),
        in_specs=[pl.BlockSpec((tk, F), lambda i: (i, 0)),
                  pl.BlockSpec((K, F), lambda i: (0, 0)),     # full emb stays resident
                  pl.BlockSpec((tk, K), lambda i: (i, 0))],
        out_specs=pl.BlockSpec((3,), lambda i: (0,),
                               memory_space=pltpu.MemorySpace.SMEM),
        scratch_shapes=[pltpu.SMEM((3,), jnp.float32)],
        compiler_params=cp_arb,
        cost_estimate=pl.CostEstimate(
            flops=2 * K * K * F + 6 * K * K, transcendentals=K * K,
            bytes_accessed=2 * K * F * 2 + K * K * 4 + 12),
    )(emb, emb, struc_n)

    # ---- tiny scalar epilogue ----
    source_loss = jnp.mean(ce_rows)
    s_ab, s_b, s_bb = struc_acc[0], struc_acc[1], struc_acc[2]
    kk = float(K * K)
    mb = s_b / kk                                  # mean(struc_e)
    # mean((a/mean(a) - b/mean(b))^2) expanded with the accumulated sums.
    struc_loss = (s_aa - 2.0 * s_ab / mb + s_bb / (mb * mb)) / kk
    loss = source_loss + struc_weight * struc_loss
    return loss, source_loss, struc_loss


# ------------------------ pure-JAX reference (correctness check) ------------------------

def _ref_forward(x_img, y, params, temperature, struc_weight):
    N, C, H, W = x_img.shape
    K = params["struc"].shape[0]
    pooled = x_img.reshape(N, C, H * W).mean(-1)
    feat = pooled @ params["w_cnn"] + params["b_cnn"]
    x = feat / jnp.maximum(jnp.linalg.norm(feat, axis=1, keepdims=True), 1e-12)
    x = x / temperature
    emb = params["emb_raw"][:K] @ params["w_emb"] + params["b_emb"]
    emb = emb / jnp.maximum(jnp.linalg.norm(emb, axis=1, keepdims=True), 1e-12)
    p = x @ emb.T
    sq = jnp.sum(emb * emb, axis=1)
    struc_e = jnp.sqrt(jnp.maximum(sq[:, None] + sq[None, :] - 2.0 * emb @ emb.T, 0.0))
    a = params["struc"] / jnp.mean(params["struc"])
    b = struc_e / jnp.mean(struc_e)
    struc_loss = jnp.mean((a - b) ** 2)
    lse = jax.scipy.special.logsumexp(p, axis=1)
    source_loss = jnp.mean(lse - p[jnp.arange(N), y])
    return source_loss + struc_weight * struc_loss, source_loss, struc_loss


# ------------------------------------- main ----------------------------------------------

if __name__ == "__main__":
    # Small synthetic shapes (lane-dense feature dims); tiles chosen so every grid has
    # >1 step to exercise the tiled/accumulating paths.
    N, C, H, W = 16, 4, 16, 16         # image batch (NCHW)
    feat_dim = 128                     # CNN feature dim == embedding_dim
    total_classes, word_dim = 40, 128  # raw word embeddings
    K = 32                             # class_num (stands in for the [:5000] slice)
    temperature = 0.1
    struc_weight = 0.5

    key = jax.random.PRNGKey(0)
    k1, k2, k3, k4, k5, k6 = jax.random.split(key, 6)

    x_img = jax.random.normal(k1, (N, C, H, W), dtype=jnp.float32)
    y = jax.random.randint(k2, (N,), 0, K, dtype=jnp.int32)

    params = {
        "w_cnn": 0.1 * jax.random.normal(k3, (C, feat_dim), dtype=jnp.float32),
        "b_cnn": jnp.zeros((1, feat_dim), dtype=jnp.float32),
        "emb_raw": jax.random.normal(k4, (total_classes, word_dim), dtype=jnp.float32),
        "w_emb": 0.1 * jax.random.normal(k5, (word_dim, feat_dim), dtype=jnp.float32),
        "b_emb": 0.01 * jax.random.normal(k6, (1, feat_dim), dtype=jnp.float32),
    }
    # __init__: self.struc = euclidean_struc_func(self.embeddings[:class_num]) on the RAW
    # word embeddings — one-time constant buffer.
    raw_k = params["emb_raw"][:K]
    rsq = jnp.sum(raw_k * raw_k, axis=1)
    params["struc"] = jnp.sqrt(jnp.maximum(
        rsq[:, None] + rsq[None, :] - 2.0 * raw_k @ raw_k.T, 0.0))

    loss, src_loss, struc_loss = cdzs_forward_train(
        x_img, y, params, temperature=temperature, struc_weight=struc_weight,
        batch_tile=8, class_tile=16)   # small tiles -> 2-step grids at test shapes
    jax.block_until_ready(loss)

    ref = _ref_forward(x_img, y, params, temperature, struc_weight)
    # bf16 MXU operands (f32 accumulation / losses) -> slightly looser atol than pure f32.
    assert jnp.allclose(loss, ref[0], rtol=2e-2, atol=5e-2), (loss, ref[0])
    assert jnp.allclose(src_loss, ref[1], rtol=2e-2, atol=5e-2), (src_loss, ref[1])
    assert jnp.allclose(struc_loss, ref[2], rtol=2e-2, atol=5e-2), (struc_loss, ref[2])

    print("KERNEL_OK")
</pallas_src>

<mosaic_0001>
module attributes {stable_mosaic.version = 11 : i64} {
  func.func @_emb_kernel(%arg0: i32, %arg1: memref<16x128xbf16, #tpu.memory_space<vmem>>, %arg2: memref<128x128xbf16, #tpu.memory_space<vmem>>, %arg3: memref<1x128xf32, #tpu.memory_space<vmem>>, %arg4: memref<16x128xbf16, #tpu.memory_space<vmem>>) attributes {dimension_semantics = [#tpu.dimension_semantics<parallel>], iteration_bounds = array<i64: 2>, scalar_prefetch = 0 : i64, scratch_operands = 0 : i64, tpu.core_type = #tpu.core_type<tc>, window_params = [{transform_indices = @transform_0, window_bounds = array<i64: 16, 128>}, {pipeline_mode = #tpu.pipeline_mode<synchronous>, transform_indices = @transform_1, window_bounds = array<i64: 128, 128>}, {pipeline_mode = #tpu.pipeline_mode<synchronous>, transform_indices = @transform_2, window_bounds = array<i64: 1, 128>}, {transform_indices = @transform_3, window_bounds = array<i64: 16, 128>}]} {
    %c0 = arith.constant 0 : index
    %c0_0 = arith.constant 0 : index
    %0 = vector.load %arg1[%c0, %c0_0] : memref<16x128xbf16, #tpu.memory_space<vmem>>, vector<16x128xbf16>
    %c0_1 = arith.constant 0 : index
    %c0_2 = arith.constant 0 : index
    %1 = vector.load %arg2[%c0_1, %c0_2] : memref<128x128xbf16, #tpu.memory_space<vmem>>, vector<128x128xbf16>
    %cst = arith.constant dense<0.000000e+00> : vector<16x128xf32>
    %2 = tpu.matmul %0, %1, %cst {dimension_numbers = #tpu.dot_dimension_numbers<[1], [0], [0], [1], [0, 0, 1, 1], [], []>} : vector<16x128xbf16>, vector<128x128xbf16>, vector<16x128xf32> -> vector<16x128xf32>
    %c0_3 = arith.constant 0 : index
    %c0_4 = arith.constant 0 : index
    %3 = vector.load %arg3[%c0_3, %c0_4] : memref<1x128xf32, #tpu.memory_space<vmem>>, vector<1x128xf32>
    %4 = vector.broadcast %3 : vector<1x128xf32> to vector<16x128xf32>
    %5 = arith.addf %2, %4 : vector<16x128xf32>
    %6 = arith.mulf %5, %5 : vector<16x128xf32>
    %cst_5 = arith.constant dense<0.000000e+00> : vector<16xf32>
    %7 = vector.multi_reduction <add>, %6, %cst_5 [1] : vector<16x128xf32> to vector<16xf32>
    %8 = vector.shape_cast %7 : vector<16xf32> to vector<16x1xf32>
    %cst_6 = arith.constant 1.000000e-24 : f32
    %9 = vector.broadcast %cst_6 : f32 to vector<16x1xf32>
    %10 = arith.maximumf %8, %9 : vector<16x1xf32>
    %11 = math.rsqrt %10 : vector<16x1xf32>
    %12 = vector.broadcast %11 : vector<16x1xf32> to vector<16x128xf32>
    %13 = arith.mulf %5, %12 : vector<16x128xf32>
    %14 = arith.truncf %13 : vector<16x128xf32> to vector<16x128xbf16>
    %c0_7 = arith.constant 0 : index
    %c0_8 = arith.constant 0 : index
    %15 = vector.load %arg4[%c0_7, %c0_8] : memref<16x128xbf16, #tpu.memory_space<vmem>>, vector<16x128xbf16>
    tpu.vector_store %arg4[%c0_7, %c0_8], %14 {strides = array<i32>} : memref<16x128xbf16, #tpu.memory_space<vmem>>, vector<16x128xbf16>,
    return
  }
  func.func @transform_0(%arg0: i32) -> (i32, i32) {
    %c0_i32 = arith.constant 0 : i32
    %c0_i32_0 = arith.constant 0 : i32
    return %arg0, %c0_i32 : i32, i32
  }
  func.func @transform_1(%arg0: i32) -> (i32, i32) {
    %c0_i32 = arith.constant 0 : i32
    %c0_i32_0 = arith.constant 0 : i32
    %c0_i32_1 = arith.constant 0 : i32
    return %c0_i32, %c0_i32_0 : i32, i32
  }
  func.func @transform_2(%arg0: i32) -> (i32, i32) {
    %c0_i32 = arith.constant 0 : i32
    %c0_i32_0 = arith.constant 0 : i32
    %c0_i32_1 = arith.constant 0 : i32
    return %c0_i32, %c0_i32_0 : i32, i32
  }
  func.func @transform_3(%arg0: i32) -> (i32, i32) {
    %c0_i32 = arith.constant 0 : i32
    %c0_i32_0 = arith.constant 0 : i32
    return %arg0, %c0_i32 : i32, i32
  }
}

</mosaic_0001>

<bundles_post_ra>
// kernel: tpu_custom_call.1
= control target key start
LH: loop header
LB: loop body
LE: loop exit
PB: predicated region body
PF: predicated region fallthrough
CT: control target
= control target key end

     0   :  { %8 = vsyncpa [#allocation3], 0  ;;  %s964_s0 = inlined_call_operand.hbm [shape: bf16[32,128], index: 0, kind: input, shape index: {}]   ;;  %s965_s1 = inlined_call_operand.hbm [shape: bf16[128,128], index: 1, kind: input, shape index: {}]   ;;  %s966_s2 = inlined_call_operand.vmem [shape: f32[1,128], index: 2, kind: input, shape index: {}]   ;;  %s967_s3 = inlined_call_operand.hbm [shape: bf16[32,128], index: 3, kind: output, shape index: {}]  }
   0x1   :  { %10 = vsyncpa [#allocation3 + $0x1], 0 }
   0x2   :  { %11 = vsyncpa [#allocation6], 0 }
   0x3   :  { %12 = vsyncpa [#allocation4], 0 }
   0x4   :  { %14 = vsyncpa [#allocation4 + $0x1], 0  ;;  %s747_s12 = smov 0   ;;  %s749_s13 = smov 0  }
   0x5   :  { %s751_s14 = smov 0   ;;  %s753_s15 = smov 0  }
   0x6 LB: > { %s768_s16 = sadd.s32 4294967295, %s716_s15   ;;  %s446_s17 = sadd.s32 4294967294, %s716_s15   ;;  %s716_s15 = sphi %s753_s15, %s987_s15   ;;  %s712_s14 = sphi %s751_s14, %s986_s14   ;;  %s708_s13 = sphi %s749_s13, %s985_s13   ;;  %s704_s12 = sphi %s747_s12, %s984_s12  }
   0x7   : > { %p40_p0 = scmp.ne.s32.totalorder %s708_s13, %s704_s12  ;;  %p968_p1 = scmp.eq.s32.totalorder %s768_s16, 0 }
   0x8   : > { %p112_p3 = scmp.eq.s32.totalorder %s446_s17, 1  ;;  %p447_p5 = scmp.ge.s32.totalorder %s716_s15, 1 }
   0x9   : > { %p777_p4 = por %p968_p1, %p40_p0  ;;  %p119_p7 = scmp.lt.s32.totalorder %s716_s15, 3 }
   0xa   : > { %p782_p6 = por %p112_p3, %p40_p0  ;;  %s718_s21 = smov [#allocation5]  }
   0xb   : > { %s971_s18 = scalar_select %p777_p4, 1, 0 }
   0xc   : > { %s972_s19 = scalar_select %p782_p6, 1, 0 }
   0xd   : > { %p787_p8 = pnand %p447_p5, %p119_p7  ;;  %s131_s22 = sshll.u32 %s718_s21, 4  ;;  %s791_s22 = int_to_ptr.vmem [resolvable:$true] %s131_s22 }
   0xe   : > { %s803_s24 = sadd.s32 1, %s716_s15   ;;  %s27_s25 = sadd.s32 1, %s712_s14 }
   0xf   : > { %s973_s20 = scalar_select %p787_p8, 1, 0 }
  0x10   : > { %p520_p9 = pneg %p787_p8  ;;  %s24_s26 = ssub.s32 %s716_s15, %s803_s24 }
  0x11   : > { %s588_s29 = scalar_lea.hbm %s965_s1, 1024 }
  0x12   : > { %p798_p11 = pnand %p520_p9, %p968_p1  ;;  %p589_p12 = scmp.ne.s32.totalorder %s965_s1, %s588_s29 }
  0x13   : > { %p595_p5 = scmp.lt.u32.totalorder %s588_s29, %s965_s1 }
  0x14   : > { %p590_p13 = pneg %p798_p11 }
  0x16   : > { %p591_p0 = pnand %p590_p13, %p589_p12 }
  0x18   : > { %p592_p3 = pneg %p591_p0 }
  0x1a   : > { %p597_p7 = pnand %p595_p5, %p592_p3 }
  0x1c   : > { %600 = shalt.err (!%p597_p7)
}
  0x1d   : > { %s601_s7 = scalar_lea.vmem %s791_s22, 1024  ;;  %p609_p2 = scmp.lt.s32.totalorder %s791_s22, %s791_s22 }
  0x1e   : > { %p602_p9 = scmp.ne.s32.totalorder %s791_s22, %s601_s7  ;;  %p610_p6 = scmp.lt.s32.totalorder %s601_s7, %s601_s7 }
  0x20   : > { %p604_p10 = pnand %p602_p9, %p590_p13  ;;  %p611_p4 = por %p610_p6, %p609_p2 }
  0x22   : > { %p605_p1 = pneg %p604_p10 }
  0x24   : > { %p612_p8 = pnand %p611_p4, %p605_p1 }
  0x26   : > { %615 = shalt.err (!%p612_p8)
}
  0x27   : > { %s719_s8 = smov 64   ;;  %s720_s9 = smov 4  }
  0x28   : > { %523 = dma.hbm_to_vmem [thread:$0]  (!%p798_p11), %s965_s1, 1024, %s791_s22, [#allocation6], %s719_s8, %s719_s8, %s720_s9  }
  0x29   : > { %p25_p1 = scmp.eq.s32.totalorder %s24_s26, 0  ;;  %p34_p2 = scmp.ne.s32.totalorder %s712_s14, %s708_s13 }
  0x2a   : > { %p35_p4 = scmp.eq.s32.totalorder %s716_s15, 0  ;;  %p533_p6 = scmp.lt.s32.totalorder %s716_s15, 2 }
  0x2b   : > { %s837_s17 = scalar_select %p25_p1, %s712_s14, %s27_s25  }
  0x2c   : > { %p36_p8 = por %p35_p4, %p34_p2  ;;  %p975_p10 = scmp.eq.s32.totalorder %s768_s16, 1 }
  0x2d   : > { %s148_s23 = sand.u32 1, %s712_s14   ;;  %s474_s27 = sshll.u32 %s716_s15, 7 }
  0x2e   : > { %p841_p12 = por %p975_p10, %p34_p2  ;;  %s450_s28 = sshll.u32 %s148_s23, 3 }
  0x2f   : > { %s850_s4 = scalar_lea.hbm %s964_s0, %s474_s27  ;;  %s152_s22 = scalar_lea.vmem [#allocation2], %s450_s28 }
  0x30   : > { %s159_s25 = sshll.u32 %s152_s22, 4  ;;  %p852_p11 = pnand %p533_p6, %p36_p8  ;;  %s856_s25 = int_to_ptr.vmem [resolvable:$true] %s159_s25 }
  0x31   : > { %s858_s5 = scalar_lea.sflag [#allocation3], %s148_s23  ;;  %s616_s6 = scalar_lea.hbm %s850_s4, 128 }
  0x32   : > { %p617_p13 = scmp.ne.s32.totalorder %s850_s4, %s616_s6  ;;  %p618_p0 = pneg %p852_p11 }
  0x33   : > { %s621_s11 = scalar_lea.hbm %s964_s0, 256  ;;  %p622_p7 = scmp.lt.u32.totalorder %s850_s4, %s964_s0 }
  0x34   : > { %p619_p3 = pnand %p618_p0, %p617_p13  ;;  %p623_p9 = scmp.lt.u32.totalorder %s621_s11, %s616_s6 }
  0x35   : > { %p625_p2 = scmp.lt.u32.totalorder %s616_s6, %s850_s4 }
  0x36   : > { %p620_p5 = pneg %p619_p3  ;;  %p624_p1 = por %p623_p9, %p622_p7 }
  0x38   : > { %p626_p4 = por %p625_p2, %p624_p1 }
  0x3a   : > { %p627_p6 = pnand %p626_p4, %p620_p5 }
  0x3c   : > { %630 = shalt.err (!%p627_p6)
}
  0x3d   : > { %s631_s23 = scalar_lea.vmem %s856_s25, 128  ;;  %s721_s29 = smov [#allocation2]  }
  0x3e   : > { %p632_p8 = scmp.ne.s32.totalorder %s856_s25, %s631_s23  ;;  %s636_s30 = sshll.u32 %s721_s29, 4  ;;  %s637_s30 = int_to_ptr.vmem [resolvable:$false] %s636_s30 }
  0x3f   : > { %s638_s22 = scalar_lea.vmem %s637_s30, 256  ;;  %p639_p3 = scmp.lt.s32.totalorder %s856_s25, %s637_s30 }
  0x40   : > { %p634_p10 = pnand %p632_p8, %p618_p0  ;;  %p640_p7 = scmp.lt.s32.totalorder %s638_s22, %s631_s23 }
  0x42   : > { %p635_p13 = pneg %p634_p10  ;;  %p641_p9 = por %p640_p7, %p639_p3 }
  0x44   : > { %p642_p1 = pnand %p641_p9, %p635_p13 }
  0x46   : > { %645 = shalt.err (!%p642_p1)
}
  0x47   : > { %527 = dma.hbm_to_vmem [thread:$0]  (!%p852_p11), %s850_s4, 128, %s856_s25, %s858_s5, %s719_s8, %s719_s8, %s720_s9  }
  0x48   : > { %p978_p0 = scmp.ne.s32.totalorder %s973_s20, 0 }
  0x49   : > { %s892_s6 = sand.u32 (!%p978_p0), 1, %s708_s13   ;;  %p979_p5 = scmp.ne.s32.totalorder (!%p978_p0), %s971_s18, 0 }
  0x4a   : > { %171 = sbr.rel (%p978_p0) target bundleno = 512 (0x200), region = 32  ;;  %s454_s7 = sshll.u32 (!%p978_p0), %s892_s6, 3 }
  0x4b   : > { %s174_s10 = scalar_lea.sflag (!%p978_p0), [#allocation3], %s892_s6  ;;  %s898_s26 = scalar_lea.vmem (!%p978_p0), [#allocation2], %s454_s7 }
  0x51   : > { %691 = dma.done.wait (%p979_p5), %s174_s10, 128  }
  0x52   : > { %693 = vsyncadd (%p979_p5), %s174_s10, 4294967168  ;;  %p980_p11 = scmp.eq.s32.totalorder %s768_s16, 0 }
  0x54   : > { %695 = dma.done.wait (%p980_p11), [#allocation6], 1024   ;;  %p981_p2 = pmov %p980_p11 }
  0x55   : > { %v722_v0 = vmov 0.0   ;;  %vm723_vm0 = vmmov 0   ;;  %v575_v1 = vld [vmem:[#allocation5] sm:$0xff]   ;;  %v576_v2 = vld [vmem:[#allocation5 + $0x8] sm:$0xff]   ;;  %v577_v3 = vld [vmem:[#allocation5 + $0x10] sm:$0xff]   ;;  %s477_s8 = sshll.u32 %s768_s16, 7 }
  0x56   : > { %697 = vsyncadd (%p981_p2), [#allocation6], 4294966272  ;;  %492 = vmatprep.subr.bf16.mxu0 %v722_v0  ;;  %508 = vmatprep.mubr.msk.bf16.mxu0 %vm723_vm0, %v722_v0  ;;  %v578_v4 = vld [vmem:[#allocation5 + $0x18] sm:$0xff]   ;;  %v579_v5 = vld [vmem:[#allocation5 + $0x20] sm:$0xff]   ;;  %s203_s9 = scalar_lea.vmem [#allocation7], %s454_s7  ;;  %s918_s11 = scalar_lea.hbm %s967_s3, %s477_s8 }
  0x57   : > { %493 = vmatpush3.bf16.msra.mxu0 %v575_v1  ;;  %v580_v6 = vld [vmem:[#allocation5 + $0x28] sm:$0xff]   ;;  %v581_v7 = vld [vmem:[#allocation5 + $0x30] sm:$0xff]   ;;  %v582_v8 = vld [vmem:[#allocation5 + $0x38] sm:$0xff]   ;;  %s363_s4 = sshll.u32 %s203_s9, 4  ;;  %s350_s27 = scalar_lea.sflag [#allocation4], %s892_s6  ;;  %s920_s4 = int_to_ptr.vmem [resolvable:$true] %s363_s4 }
  0x58   : > { %494 = vmatprep.subr.bf16.mxu0 %v722_v0  ;;  %v583_v9 = vld [vmem:[%s898_s26] sm:$0xff]   ;;  %s646_s16 = scalar_lea.vmem %s920_s4, 128  ;;  %s724_s28 = smov [#allocation7]  }
  0x59   : > { %v457_v10 = vld [vmem:[%s966_s2] ss:$0 sm:$0xff]  ;;  %p647_p4 = scmp.ne.s32.totalorder %s920_s4, %s646_s16  ;;  %s650_s23 = sshll.u32 %s724_s28, 4  ;;  %s651_s23 = int_to_ptr.vmem [resolvable:$false] %s650_s23 }
  0x5a   : > { %s652_s29 = scalar_lea.vmem %s651_s23, 256  ;;  %p653_p10 = scmp.lt.s32.totalorder %s920_s4, %s651_s23 }
  0x5b   : > { %495 = vmatpush3.bf16.msra.mxu0 %v576_v2  ;;  %p648_p6 = pnand %p647_p4, %p841_p12  ;;  %p654_p13 = scmp.lt.s32.totalorder %s652_s29, %s646_s16 }
  0x5c   : > { %496 = vmatprep.subr.bf16.mxu0 %v722_v0 }
  0x5d   : > { %p649_p8 = pneg %p648_p6  ;;  %p655_p3 = por %p654_p13, %p653_p10 }
  0x5f   : > { %497 = vmatpush3.bf16.msra.mxu0 %v577_v3  ;;  %p656_p7 = pnand %p655_p3, %p649_p8 }
  0x60   : > { %498 = vmatprep.subr.bf16.mxu0 %v722_v0 }
  0x63   : > { %499 = vmatpush3.bf16.msra.mxu0 %v578_v4 }
  0x64   : > { %500 = vmatprep.subr.bf16.mxu0 %v722_v0 }
  0x67   : > { %501 = vmatpush3.bf16.msra.mxu0 %v579_v5 }
  0x68   : > { %502 = vmatprep.subr.bf16.mxu0 %v722_v0 }
  0x6b   : > { %503 = vmatpush3.bf16.msra.mxu0 %v580_v6 }
  0x6c   : > { %504 = vmatprep.subr.bf16.mxu0 %v722_v0 }
  0x6f   : > { %505 = vmatpush3.bf16.msra.mxu0 %v581_v7 }
  0x70   : > { %506 = vmatprep.subr.bf16.mxu0 %v722_v0 }
  0x73   : > { %507 = vmatpush3.bf16.msra.mxu0 %v582_v8 }
  0x76   : > { %509 = vmatmul.mubr.bf16.vlgmr.msra.gmra.mrb[0].mxu0 %v583_v9 }
 0x149   : > { %v320_v11 = vpop.f32.mrb[0].mxu0 }
 0x14a   : > { %v321_v12 = vadd.f32 %v457_v10, %v320_v11  ;;  %v510_v13 = vpop.f32.mrb[1].mxu0 }
 0x14b   : > { %v323_v14 = vpop.f32.mrb[2].mxu0 }
 0x14c   : > { %v324_v15 = vadd.f32 %v457_v10, %v323_v14  ;;  %v511_v16 = vpop.f32.mrb[3].mxu0  ;;  %v327_v17 = vmul.f32 %v321_v12, %v321_v12 }
 0x14e   : > { %329 = vadd.xlane.f32.xlu0 %v327_v17  ;;  %v328_v18 = vmul.f32 %v324_v15, %v324_v15 }
 0x152   : > { %331 = vadd.xlane.f32.xlu0 %v328_v18 }
 0x1db   : > { %v330_v19 = vpop.xlane.xlu0 %329 }
 0x1dc   : > { %v333_v20 = vmax.f32 %v330_v19, 1e-24 }
 0x1de   : > { %584 = vrsqrt.f32 %v333_v20 }
 0x1df   : > { %v332_v21 = vpop.xlane.xlu0 %331 }
 0x1e0   : > { %v334_v22 = vmax.f32 %v332_v21, 1e-24 }
 0x1e2   : > { %586 = vrsqrt.f32 %v334_v22 }
 0x1e8   : > { %v585_v23 = vpop.eup %584 }
 0x1e9   : > { %v337_v25 = vmul.f32 %v585_v23, %v321_v12 }
 0x1ec   : > { %v587_v24 = vpop.eup %586 }
 0x1ed   : > { %v338_v26 = vmul.f32 %v587_v24, %v324_v15 }
 0x1ef   : > { %v481_v27 = vpack.c.bf16 %v338_v26, %v337_v25 }
 0x1f1   : > { %482 = vst [vmem:[%s203_s9] sm:$0xff] %v481_v27  }
 0x1f2   : > { %659 = shalt.err (!%p656_p7)
}
 0x1f3   : > { %s660_s30 = scalar_lea.hbm %s918_s11, 128  ;;  %s664_s10 = scalar_lea.hbm %s967_s3, 256 }
 0x1f4   : > { %p661_p9 = scmp.ne.s32.totalorder %s918_s11, %s660_s30  ;;  %p665_p5 = scmp.lt.u32.totalorder %s918_s11, %s967_s3 }
 0x1f5   : > { %p666_p11 = scmp.lt.u32.totalorder %s664_s10, %s660_s30  ;;  %p668_p4 = scmp.lt.u32.totalorder %s660_s30, %s918_s11 }
 0x1f6   : > { %p662_p1 = pnand %p661_p9, %p841_p12 }
 0x1f7   : > { %p667_p2 = por %p666_p11, %p665_p5 }
 0x1f8   : > { %p663_p0 = pneg %p662_p1 }
 0x1f9   : > { %p669_p6 = por %p668_p4, %p667_p2 }
 0x1fb   : > { %p670_p8 = pnand %p669_p6, %p663_p0 }
 0x1fd   : > { %673 = shalt.err (!%p670_p8)
}
 0x1fe   : > { %s725_s20 = smov 64   ;;  %s726_s8 = smov 4  }
 0x1ff   : > { %518 = dma.vmem_to_hbm [thread:$0]  (%p841_p12), %s920_s4, 128, %s918_s11, %s350_s27, %s725_s20, %s725_s20, %s726_s8  }
 0x200 PF: > { %s378_s9 = sand.u32 1, %s704_s12   ;;  %p982_p10 = scmp.ne.s32.totalorder %s972_s19, 0 }
 0x201   : > { %p983_p13 = scmp.ge.s32.totalorder %s716_s15, 2  ;;  %s379_s25 = scalar_lea.sflag [#allocation4], %s378_s9 }
 0x203   : > { %p529_p3 = pnand %p983_p13, %p982_p10 }
 0x205   : > { %699 = dma.done.wait (!%p529_p3), %s379_s25, 128  }
 0x206   : > { %701 = vsyncadd (!%p529_p3), %s379_s25, 4294967168  ;;  %p17_p7 = scmp.ge.s32.totalorder %s803_s24, 4   ;;  %s984_s12 = smov %s708_s13 }
 0x207   : > { %s985_s13 = smov %s712_s14  ;;  %s986_s14 = smov %s837_s17 }
 0x208   : > { %s987_s15 = smov %s803_s24  ;;  %19 = sbr.rel (!%p17_p7) target bundleno = 6 (0x6), region = 81 }
 0x20f   :  { %384 = vsyncpa [#allocation3], 1 }
 0x210   :  { %386 = vsyncpa [#allocation3 + $0x1], 1 }
 0x211   :  { %387 = vsyncpa [#allocation6], 1 }
 0x212   :  { %388 = vsyncpa [#allocation4], 1 }
 0x213   :  { %390 = vsyncpa [#allocation4 + $0x1], 1 }

</bundles_post_ra>
